<compile_context>
chip_gen: v7x
topology: tpu7x:2x2x1
jax: 0.10.0
libtpu: 0.0.40
codegen_flags: <defaults>
</compile_context>

<pallas_src>
import jax
import jax.numpy as jnp
import numpy as np
from jax.experimental import pallas as pl
from jax.experimental.pallas import tpu as pltpu

TM = 256  # row tile for both kernels (>=2 grid blocks at the shapes used here)


def _round_up(x, m):
    return (x + m - 1) // m * m


# ----------------------------------------------------------------------------
# Pallas kernels
# ----------------------------------------------------------------------------

def _matmul_kernel(a_ref, b_ref, o_ref):
    # bf16 x bf16 -> f32 on the MXU
    o_ref[...] = jnp.dot(a_ref[...], b_ref[...],
                         preferred_element_type=jnp.float32)


def pallas_matmul(a, b):
    """(M, K) @ (K, N) -> (M, N) f32.

    A/B are fed to the MXU as bf16 (f32 result).  K and N use full-extent
    blocks (no 128-padding); only M is tiled / padded to a multiple of 8.
    """
    M, K = a.shape
    K2, N = b.shape
    assert K == K2
    tm = min(TM, _round_up(M, 8))
    Mp = _round_up(M, tm)
    a_p = a.astype(jnp.bfloat16)
    if Mp != M:
        a_p = jnp.pad(a_p, ((0, Mp - M), (0, 0)))
    b_p = b.astype(jnp.bfloat16)
    out = pl.pallas_call(
        _matmul_kernel,
        out_shape=jax.ShapeDtypeStruct((Mp, N), jnp.float32),
        grid_spec=pltpu.PrefetchScalarGridSpec(
            num_scalar_prefetch=0,
            grid=(Mp // tm,),
            in_specs=[
                pl.BlockSpec((tm, K), lambda i: (i, 0)),   # full-K block
                pl.BlockSpec((K, N), lambda i: (0, 0)),    # full weight block
            ],
            out_specs=pl.BlockSpec((tm, N), lambda i: (i, 0)),
        ),
        compiler_params=pltpu.CompilerParams(
            dimension_semantics=("parallel",)),
    )(a_p, b_p)
    return out[:M] if Mp != M else out


def _scale_shift_relu_kernel(x_ref, s_ref, t_ref, o_ref):
    o_ref[...] = jnp.maximum(x_ref[...] * s_ref[...] + t_ref[...], 0.0)


def pallas_scale_shift_relu(x, scale, shift):
    """Per-column affine (folded BatchNorm) + ReLU on a (M, C) f32 matrix."""
    M, C = x.shape
    tm = min(TM, _round_up(M, 8))
    Mp = _round_up(M, tm)
    x_p = x.astype(jnp.float32)
    if Mp != M:
        x_p = jnp.pad(x_p, ((0, Mp - M), (0, 0)))
    out = pl.pallas_call(
        _scale_shift_relu_kernel,
        out_shape=jax.ShapeDtypeStruct((Mp, C), jnp.float32),
        grid_spec=pltpu.PrefetchScalarGridSpec(
            num_scalar_prefetch=0,
            grid=(Mp // tm,),
            in_specs=[
                pl.BlockSpec((tm, C), lambda i: (i, 0)),
                pl.BlockSpec((1, C), lambda i: (0, 0)),
                pl.BlockSpec((1, C), lambda i: (0, 0)),
            ],
            out_specs=pl.BlockSpec((tm, C), lambda i: (i, 0)),
        ),
        compiler_params=pltpu.CompilerParams(
            dimension_semantics=("parallel",)),
    )(x_p,
      scale.astype(jnp.float32).reshape(1, C),
      shift.astype(jnp.float32).reshape(1, C))
    return out[:M] if Mp != M else out


# ----------------------------------------------------------------------------
# Plain-JAX glue (layout, patch extraction, BN statistics)
# ----------------------------------------------------------------------------

def _bn_fold(y_per_channel, gamma, beta, eps=1e-5):
    """Training-mode BatchNorm folded into per-channel scale/shift."""
    mean = jnp.mean(y_per_channel, axis=0)
    var = jnp.mean(jnp.square(y_per_channel - mean), axis=0)  # biased, as PyTorch
    scale = gamma * jax.lax.rsqrt(var + eps)
    shift = beta - mean * scale
    return scale, shift


def conv3x3_bn_relu(x, w, gamma, beta):
    """Conv2d(Cin, Cout, 3, padding=1) [bias cancelled by BN] + BN + ReLU.
    x: NHWC f32;  w: (3, 3, Cin, Cout)."""
    N, H, W, Cin = x.shape
    Cout = w.shape[-1]
    xp = jnp.pad(x, ((0, 0), (1, 1), (1, 1), (0, 0)))           # zero pad=1
    cols = [xp[:, dy:dy + H, dx:dx + W, :] for dy in range(3) for dx in range(3)]
    patches = jnp.concatenate(cols, axis=-1).reshape(N * H * W, 9 * Cin)
    y = pallas_matmul(patches, w.reshape(9 * Cin, Cout))         # (N*H*W, Cout)
    scale, shift = _bn_fold(y, gamma, beta)
    y = pallas_scale_shift_relu(y, scale, shift)
    return y.reshape(N, H, W, Cout)


def conv_transpose2x_bn_relu(x, wt, gamma, beta):
    """ConvTranspose2d(Cin, Cout, 3, stride=2, padding=1, output_padding=1)
    [bias cancelled by BN] + BN + ReLU, via sub-pixel (4-phase) decomposition.
    x: NHWC f32;  wt: (3, 3, Cin, Cout)  (== PyTorch weight[ci, co, kh, kw])."""
    N, H, W, Cin = x.shape
    Cout = wt.shape[-1]

    # 2x2 input patches, zero-padded one row/col at the bottom/right.
    xp = jnp.pad(x, ((0, 0), (0, 1), (0, 1), (0, 0)))
    cols = [xp[:, a:a + H, b:b + W, :] for a in (0, 1) for b in (0, 1)]
    patches = jnp.concatenate(cols, axis=-1).reshape(N * H * W, 4 * Cin)

    # Weight matrix mapping the 4 input taps -> 4 output phases (oh%2, ow%2).
    # out[2i+ph, 2j+pw] = sum over taps of x[i+a, j+b] * wt[kh, kw] with
    # kh = 2*(i+a) + 1 - (2i+ph), kw analogous.
    z = jnp.zeros((Cin, Cout), jnp.float32)
    row_ij = jnp.concatenate([wt[1, 1], wt[1, 2], wt[2, 1], wt[2, 2]], axis=1)
    row_ij1 = jnp.concatenate([z,        wt[1, 0], z,        wt[2, 0]], axis=1)
    row_i1j = jnp.concatenate([z,        z,        wt[0, 1], wt[0, 2]], axis=1)
    row_i1j1 = jnp.concatenate([z,       z,        z,        wt[0, 0]], axis=1)
    b2 = jnp.concatenate([row_ij, row_ij1, row_i1j, row_i1j1], axis=0)

    y = pallas_matmul(patches, b2)                    # (N*H*W, 4*Cout)

    # BN stats are per real output channel (Cout), over all 4 phases.
    scale, shift = _bn_fold(y.reshape(-1, Cout), gamma, beta)
    y = pallas_scale_shift_relu(y, jnp.tile(scale, 4), jnp.tile(shift, 4))

    # (N*H*W, 4*Cout) -> (N, 2H, 2W, Cout)
    y = y.reshape(N, H, W, 2, 2, Cout)
    y = jnp.transpose(y, (0, 1, 3, 2, 4, 5)).reshape(N, 2 * H, 2 * W, Cout)
    return y


# ----------------------------------------------------------------------------
# Full forward pass (NCHW in / NCHW out, matching the PyTorch module)
# ----------------------------------------------------------------------------

def decoder_block_v1_forward(x_nchw, params):
    x = jnp.transpose(x_nchw, (0, 2, 3, 1)).astype(jnp.float32)  # NCHW -> NHWC
    h = conv3x3_bn_relu(x, params['conv_w'],
                        params['bn1_gamma'], params['bn1_beta'])
    y = conv_transpose2x_bn_relu(h, params['tconv_w'],
                                 params['bn2_gamma'], params['bn2_beta'])
    return jnp.transpose(y, (0, 3, 1, 2))                        # back to NCHW


# ----------------------------------------------------------------------------
# Deterministic parameter construction
# ----------------------------------------------------------------------------

def make_params(in_ch, mid_ch, out_ch, key):
    k = jax.random.split(key, 6)
    return {
        'conv_w': (1.0 / np.sqrt(9 * in_ch)) *
                  jax.random.normal(k[0], (3, 3, in_ch, mid_ch), jnp.float32),
        'bn1_gamma': 1.0 + 0.1 * jax.random.normal(k[1], (mid_ch,), jnp.float32),
        'bn1_beta': 0.1 * jax.random.normal(k[2], (mid_ch,), jnp.float32),
        'tconv_w': (1.0 / np.sqrt(9 * mid_ch)) *
                   jax.random.normal(k[3], (3, 3, mid_ch, out_ch), jnp.float32),
        'bn2_gamma': 1.0 + 0.1 * jax.random.normal(k[4], (out_ch,), jnp.float32),
        'bn2_beta': 0.1 * jax.random.normal(k[5], (out_ch,), jnp.float32),
    }


# ----------------------------------------------------------------------------

if __name__ == "__main__":
    BATCH, IN_CH, MID_CH, OUT_CH, H, W = 2, 4, 16, 8, 16, 16

    key = jax.random.PRNGKey(0)
    kx, kp = jax.random.split(key)
    x = jax.random.normal(kx, (BATCH, IN_CH, H, W), dtype=jnp.float32)
    params = make_params(IN_CH, MID_CH, OUT_CH, kp)

    fwd = jax.jit(decoder_block_v1_forward)
    out = fwd(x, params)
    out = jax.block_until_ready(out)

    assert out.shape == (BATCH, OUT_CH, 2 * H, 2 * W), out.shape
    assert bool(jnp.all(jnp.isfinite(out)))
    assert bool(jnp.all(out >= 0.0))   # final ReLU
    print("KERNEL_OK")
</pallas_src>

<mosaic_0001>
module attributes {stable_mosaic.version = 11 : i64} {
  func.func @_matmul_kernel(%arg0: i32, %arg1: memref<256x36xbf16, #tpu.memory_space<vmem>>, %arg2: memref<36x16xbf16, #tpu.memory_space<vmem>>, %arg3: memref<256x16xf32, #tpu.memory_space<vmem>>) attributes {dimension_semantics = [#tpu.dimension_semantics<parallel>], iteration_bounds = array<i64: 2>, scalar_prefetch = 0 : i64, scratch_operands = 0 : i64, tpu.core_type = #tpu.core_type<tc>, window_params = [{transform_indices = @transform_0, window_bounds = array<i64: 256, 36>}, {pipeline_mode = #tpu.pipeline_mode<synchronous>, transform_indices = @transform_1, window_bounds = array<i64: 36, 16>}, {transform_indices = @transform_2, window_bounds = array<i64: 256, 16>}]} {
    %c0 = arith.constant 0 : index
    %c0_0 = arith.constant 0 : index
    %0 = vector.load %arg1[%c0, %c0_0] : memref<256x36xbf16, #tpu.memory_space<vmem>>, vector<256x36xbf16>
    %c0_1 = arith.constant 0 : index
    %c0_2 = arith.constant 0 : index
    %1 = vector.load %arg2[%c0_1, %c0_2] : memref<36x16xbf16, #tpu.memory_space<vmem>>, vector<36x16xbf16>
    %cst = arith.constant dense<0.000000e+00> : vector<256x16xf32>
    %2 = tpu.matmul %0, %1, %cst {dimension_numbers = #tpu.dot_dimension_numbers<[1], [0], [0], [1], [0, 0, 1, 1], [], []>} : vector<256x36xbf16>, vector<36x16xbf16>, vector<256x16xf32> -> vector<256x16xf32>
    %c0_3 = arith.constant 0 : index
    %c0_4 = arith.constant 0 : index
    %3 = vector.load %arg3[%c0_3, %c0_4] : memref<256x16xf32, #tpu.memory_space<vmem>>, vector<256x16xf32>
    tpu.vector_store %arg3[%c0_3, %c0_4], %2 {strides = array<i32>} : memref<256x16xf32, #tpu.memory_space<vmem>>, vector<256x16xf32>,
    return
  }
  func.func @transform_0(%arg0: i32) -> (i32, i32) {
    %c0_i32 = arith.constant 0 : i32
    %c0_i32_0 = arith.constant 0 : i32
    return %arg0, %c0_i32 : i32, i32
  }
  func.func @transform_1(%arg0: i32) -> (i32, i32) {
    %c0_i32 = arith.constant 0 : i32
    %c0_i32_0 = arith.constant 0 : i32
    %c0_i32_1 = arith.constant 0 : i32
    return %c0_i32, %c0_i32_0 : i32, i32
  }
  func.func @transform_2(%arg0: i32) -> (i32, i32) {
    %c0_i32 = arith.constant 0 : i32
    %c0_i32_0 = arith.constant 0 : i32
    return %arg0, %c0_i32 : i32, i32
  }
}

module attributes {stable_mosaic.version = 11 : i64} {
  func.func @_scale_shift_relu_kernel(%arg0: i32, %arg1: memref<256x16xf32, #tpu.memory_space<vmem>>, %arg2: memref<1x16xf32, #tpu.memory_space<vmem>>, %arg3: memref<1x16xf32, #tpu.memory_space<vmem>>, %arg4: memref<256x16xf32, #tpu.memory_space<vmem>>) attributes {dimension_semantics = [#tpu.dimension_semantics<parallel>], iteration_bounds = array<i64: 2>, scalar_prefetch = 0 : i64, scratch_operands = 0 : i64, tpu.core_type = #tpu.core_type<tc>, window_params = [{transform_indices = @transform_0, window_bounds = array<i64: 256, 16>}, {pipeline_mode = #tpu.pipeline_mode<synchronous>, transform_indices = @transform_1, window_bounds = array<i64: 1, 16>}, {pipeline_mode = #tpu.pipeline_mode<synchronous>, transform_indices = @transform_2, window_bounds = array<i64: 1, 16>}, {transform_indices = @transform_3, window_bounds = array<i64: 256, 16>}]} {
    %c0 = arith.constant 0 : index
    %c0_0 = arith.constant 0 : index
    %0 = vector.load %arg1[%c0, %c0_0] : memref<256x16xf32, #tpu.memory_space<vmem>>, vector<256x16xf32>
    %c0_1 = arith.constant 0 : index
    %c0_2 = arith.constant 0 : index
    %1 = vector.load %arg2[%c0_1, %c0_2] : memref<1x16xf32, #tpu.memory_space<vmem>>, vector<1x16xf32>
    %2 = vector.broadcast %1 : vector<1x16xf32> to vector<256x16xf32>
    %3 = arith.mulf %0, %2 : vector<256x16xf32>
    %c0_3 = arith.constant 0 : index
    %c0_4 = arith.constant 0 : index
    %4 = vector.load %arg3[%c0_3, %c0_4] : memref<1x16xf32, #tpu.memory_space<vmem>>, vector<1x16xf32>
    %5 = vector.broadcast %4 : vector<1x16xf32> to vector<256x16xf32>
    %6 = arith.addf %3, %5 : vector<256x16xf32>
    %cst = arith.constant 0.000000e+00 : f32
    %7 = vector.broadcast %cst : f32 to vector<256x16xf32>
    %8 = arith.maximumf %6, %7 : vector<256x16xf32>
    %c0_5 = arith.constant 0 : index
    %c0_6 = arith.constant 0 : index
    %9 = vector.load %arg4[%c0_5, %c0_6] : memref<256x16xf32, #tpu.memory_space<vmem>>, vector<256x16xf32>
    tpu.vector_store %arg4[%c0_5, %c0_6], %8 {strides = array<i32>} : memref<256x16xf32, #tpu.memory_space<vmem>>, vector<256x16xf32>,
    return
  }
  func.func @transform_0(%arg0: i32) -> (i32, i32) {
    %c0_i32 = arith.constant 0 : i32
    %c0_i32_0 = arith.constant 0 : i32
    return %arg0, %c0_i32 : i32, i32
  }
  func.func @transform_1(%arg0: i32) -> (i32, i32) {
    %c0_i32 = arith.constant 0 : i32
    %c0_i32_0 = arith.constant 0 : i32
    %c0_i32_1 = arith.constant 0 : i32
    return %c0_i32, %c0_i32_0 : i32, i32
  }
  func.func @transform_2(%arg0: i32) -> (i32, i32) {
    %c0_i32 = arith.constant 0 : i32
    %c0_i32_0 = arith.constant 0 : i32
    %c0_i32_1 = arith.constant 0 : i32
    return %c0_i32, %c0_i32_0 : i32, i32
  }
  func.func @transform_3(%arg0: i32) -> (i32, i32) {
    %c0_i32 = arith.constant 0 : i32
    %c0_i32_0 = arith.constant 0 : i32
    return %arg0, %c0_i32 : i32, i32
  }
}

module attributes {stable_mosaic.version = 11 : i64} {
  func.func @_matmul_kernel(%arg0: i32, %arg1: memref<256x64xbf16, #tpu.memory_space<vmem>>, %arg2: memref<64x32xbf16, #tpu.memory_space<vmem>>, %arg3: memref<256x32xf32, #tpu.memory_space<vmem>>) attributes {dimension_semantics = [#tpu.dimension_semantics<parallel>], iteration_bounds = array<i64: 2>, scalar_prefetch = 0 : i64, scratch_operands = 0 : i64, tpu.core_type = #tpu.core_type<tc>, window_params = [{transform_indices = @transform_0, window_bounds = array<i64: 256, 64>}, {pipeline_mode = #tpu.pipeline_mode<synchronous>, transform_indices = @transform_1, window_bounds = array<i64: 64, 32>}, {transform_indices = @transform_2, window_bounds = array<i64: 256, 32>}]} {
    %c0 = arith.constant 0 : index
    %c0_0 = arith.constant 0 : index
    %0 = vector.load %arg1[%c0, %c0_0] : memref<256x64xbf16, #tpu.memory_space<vmem>>, vector<256x64xbf16>
    %c0_1 = arith.constant 0 : index
    %c0_2 = arith.constant 0 : index
    %1 = vector.load %arg2[%c0_1, %c0_2] : memref<64x32xbf16, #tpu.memory_space<vmem>>, vector<64x32xbf16>
    %cst = arith.constant dense<0.000000e+00> : vector<256x32xf32>
    %2 = tpu.matmul %0, %1, %cst {dimension_numbers = #tpu.dot_dimension_numbers<[1], [0], [0], [1], [0, 0, 1, 1], [], []>} : vector<256x64xbf16>, vector<64x32xbf16>, vector<256x32xf32> -> vector<256x32xf32>
    %c0_3 = arith.constant 0 : index
    %c0_4 = arith.constant 0 : index
    %3 = vector.load %arg3[%c0_3, %c0_4] : memref<256x32xf32, #tpu.memory_space<vmem>>, vector<256x32xf32>
    tpu.vector_store %arg3[%c0_3, %c0_4], %2 {strides = array<i32>} : memref<256x32xf32, #tpu.memory_space<vmem>>, vector<256x32xf32>,
    return
  }
  func.func @transform_0(%arg0: i32) -> (i32, i32) {
    %c0_i32 = arith.constant 0 : i32
    %c0_i32_0 = arith.constant 0 : i32
    return %arg0, %c0_i32 : i32, i32
  }
  func.func @transform_1(%arg0: i32) -> (i32, i32) {
    %c0_i32 = arith.constant 0 : i32
    %c0_i32_0 = arith.constant 0 : i32
    %c0_i32_1 = arith.constant 0 : i32
    return %c0_i32, %c0_i32_0 : i32, i32
  }
  func.func @transform_2(%arg0: i32) -> (i32, i32) {
    %c0_i32 = arith.constant 0 : i32
    %c0_i32_0 = arith.constant 0 : i32
    return %arg0, %c0_i32 : i32, i32
  }
}

module attributes {stable_mosaic.version = 11 : i64} {
  func.func @_scale_shift_relu_kernel(%arg0: i32, %arg1: memref<256x32xf32, #tpu.memory_space<vmem>>, %arg2: memref<1x32xf32, #tpu.memory_space<vmem>>, %arg3: memref<1x32xf32, #tpu.memory_space<vmem>>, %arg4: memref<256x32xf32, #tpu.memory_space<vmem>>) attributes {dimension_semantics = [#tpu.dimension_semantics<parallel>], iteration_bounds = array<i64: 2>, scalar_prefetch = 0 : i64, scratch_operands = 0 : i64, tpu.core_type = #tpu.core_type<tc>, window_params = [{transform_indices = @transform_0, window_bounds = array<i64: 256, 32>}, {pipeline_mode = #tpu.pipeline_mode<synchronous>, transform_indices = @transform_1, window_bounds = array<i64: 1, 32>}, {pipeline_mode = #tpu.pipeline_mode<synchronous>, transform_indices = @transform_2, window_bounds = array<i64: 1, 32>}, {transform_indices = @transform_3, window_bounds = array<i64: 256, 32>}]} {
    %c0 = arith.constant 0 : index
    %c0_0 = arith.constant 0 : index
    %0 = vector.load %arg1[%c0, %c0_0] : memref<256x32xf32, #tpu.memory_space<vmem>>, vector<256x32xf32>
    %c0_1 = arith.constant 0 : index
    %c0_2 = arith.constant 0 : index
    %1 = vector.load %arg2[%c0_1, %c0_2] : memref<1x32xf32, #tpu.memory_space<vmem>>, vector<1x32xf32>
    %2 = vector.broadcast %1 : vector<1x32xf32> to vector<256x32xf32>
    %3 = arith.mulf %0, %2 : vector<256x32xf32>
    %c0_3 = arith.constant 0 : index
    %c0_4 = arith.constant 0 : index
    %4 = vector.load %arg3[%c0_3, %c0_4] : memref<1x32xf32, #tpu.memory_space<vmem>>, vector<1x32xf32>
    %5 = vector.broadcast %4 : vector<1x32xf32> to vector<256x32xf32>
    %6 = arith.addf %3, %5 : vector<256x32xf32>
    %cst = arith.constant 0.000000e+00 : f32
    %7 = vector.broadcast %cst : f32 to vector<256x32xf32>
    %8 = arith.maximumf %6, %7 : vector<256x32xf32>
    %c0_5 = arith.constant 0 : index
    %c0_6 = arith.constant 0 : index
    %9 = vector.load %arg4[%c0_5, %c0_6] : memref<256x32xf32, #tpu.memory_space<vmem>>, vector<256x32xf32>
    tpu.vector_store %arg4[%c0_5, %c0_6], %8 {strides = array<i32>} : memref<256x32xf32, #tpu.memory_space<vmem>>, vector<256x32xf32>,
    return
  }
  func.func @transform_0(%arg0: i32) -> (i32, i32) {
    %c0_i32 = arith.constant 0 : i32
    %c0_i32_0 = arith.constant 0 : i32
    return %arg0, %c0_i32 : i32, i32
  }
  func.func @transform_1(%arg0: i32) -> (i32, i32) {
    %c0_i32 = arith.constant 0 : i32
    %c0_i32_0 = arith.constant 0 : i32
    %c0_i32_1 = arith.constant 0 : i32
    return %c0_i32, %c0_i32_0 : i32, i32
  }
  func.func @transform_2(%arg0: i32) -> (i32, i32) {
    %c0_i32 = arith.constant 0 : i32
    %c0_i32_0 = arith.constant 0 : i32
    %c0_i32_1 = arith.constant 0 : i32
    return %c0_i32, %c0_i32_0 : i32, i32
  }
  func.func @transform_3(%arg0: i32) -> (i32, i32) {
    %c0_i32 = arith.constant 0 : i32
    %c0_i32_0 = arith.constant 0 : i32
    return %arg0, %c0_i32 : i32, i32
  }
}

</mosaic_0001>

<bundles_post_ra>
// kernel: decoder_block_v1_forward.4
= control target key start
LH: loop header
LB: loop body
LE: loop exit
PB: predicated region body
PF: predicated region fallthrough
CT: control target
= control target key end

     0   :  { %s744_s9 = smov 0   ;;  %s874_s0 = inlined_call_operand.vmem [shape: bf16[512,36], index: 0, kind: input, shape index: {}]   ;;  %s875_s1 = inlined_call_operand.vmem [shape: bf16[36,16], index: 1, kind: input, shape index: {}]   ;;  %s876_s2 = inlined_call_operand.vmem [shape: f32[512,16], index: 2, kind: output, shape index: {}]  }
   0x1 LB: > { %s583_s10 = sadd.s32 4294967295, %s727_s9   ;;  %p587_p0 = scmp.ge.s32.totalorder %s727_s9, 1  ;;  %s727_s9 = sphi %s744_s9, %s12_s9  }
   0x2   : > { %p113_p1 = scmp.lt.s32.totalorder %s727_s9, 3 }
   0x4   : > { %p114_p2 = pnand %p587_p0, %p113_p1 }
   0x5   : > { %v702_v0 = vld [vmem:[%s875_s1] sm:$0xff] (!%p114_p2)   ;;  %v703_v1 = vld [vmem:[%s875_s1 + $0x8] sm:$0xff] (!%p114_p2)   ;;  %s588_s15 = sshll.u32 (!%p114_p2), %s583_s10, 5  ;;  %v704_v2 = vld [vmem:[%s875_s1 + $0x10] ss:$0 sps:$4 sm:$0x33] (!%p114_p2)  }
   0x6   : > { %117 = sbr.rel (%p114_p2) target bundleno = 259 (0x103), region = 28  ;;  %648 = vmatprep.subr.bf16.mxu0 (!%p114_p2), %v702_v0  ;;  %686 = vmatprep.subr.bf16.mxu1 (!%p114_p2), %v702_v0  ;;  %p136_p3 = scmp.lt.s32.totalorder (!%p114_p2), %s588_s15, 63  ;;  %vm329_vm0 = vcmask (!%p114_p2), 1041408   ;;  %vm280_vm1 = vcmask (!%p114_p2), 293888   ;;  %vm494_vm2 = vcmask (!%p114_p2), 130048  }
   0x7   : > { %649 = vmatpush3.bf16.msra.mxu0 (!%p114_p2), %v702_v0  ;;  %689 = vmatpush3.bf16.msra.mxu1 (!%p114_p2), %v702_v0  ;;  %v331_v3 = vsel (!%p114_p2), %vm329_vm0, %v704_v2, 0 }
   0x8   : > { %650 = vmatprep.subr.bf16.mxu0 (!%p114_p2), %v703_v1  ;;  %687 = vmatprep.subr.bf16.mxu1 (!%p114_p2), %v703_v1 }
   0xb   : > { %651 = vmatpush3.bf16.msra.mxu0 (!%p114_p2), %v703_v1  ;;  %690 = vmatpush3.bf16.msra.mxu1 (!%p114_p2), %v703_v1 }
   0xc   : > { %692 = vmatprep.subr.msk.bf16.mxu0 (!%p114_p2), %vm329_vm0, %v704_v2  ;;  %693 = vmatprep.subr.msk.bf16.mxu1 (!%p114_p2), %vm329_vm0, %v704_v2 }
   0xd   : > { %s878_s15 = smov (!%p136_p3, %s588_s15), 63 }
   0xe   : > { %s589_s18 = sshll.u32 %s878_s15, 2  ;;  %s591_s22 = sshll.u32 %s878_s15, 3 }
   0xf   : > { %s767_s21 = scalar_lea.vmem %s874_s0, %s589_s18  ;;  %653 = vmatpush3.bf16.msra.mxu0 %v331_v3  ;;  %691 = vmatpush3.bf16.msra.mxu1 %v331_v3  ;;  %s805_s25 = scalar_lea.vmem %s876_s2, %s591_s22 }
  0x10   : > { %v705_v4 = vld [vmem:[%s767_s21] sm:$0xff]   ;;  %v707_v6 = vld [vmem:[%s767_s21 + $0x8] sm:$0xff]   ;;  %v709_v8 = vld [vmem:[%s767_s21 + $0x10] sm:$0xff]  }
  0x11   : > { %v706_v5 = vld [vmem:[%s767_s21 + $0x40] sm:$0xff]   ;;  %654 = vmatprep.mubr.msk.bf16.mxu0 %vm280_vm1, %v705_v4  ;;  %v708_v7 = vld [vmem:[%s767_s21 + $0x48] sm:$0xff]   ;;  %v710_v9 = vld [vmem:[%s767_s21 + $0x50] sm:$0xff]  }
  0x12   : > { %670 = vmatprep.mubr.msk.bf16.mxu1 %vm280_vm1, %v706_v5  ;;  %655 = vmatmul.mubr.msk.bf16.vlgmr.msra.gmra.mrb[0].mxu0 %vm280_vm1, %v707_v6  ;;  %v711_v10 = vld [vmem:[%s767_s21 + $0x18] sm:$0xff]   ;;  %v713_v12 = vld [vmem:[%s767_s21 + $0x20] sm:$0xff]   ;;  %v715_v14 = vld [vmem:[%s767_s21 + $0x28] sm:$0xff]  }
  0x13   : > { %671 = vmatmul.mubr.msk.bf16.vlgmr.msra.gmra.mrb[0].mxu1 %vm280_vm1, %v708_v7  ;;  %658 = vmatprep.mubr.msk.bf16.mxu0 %vm280_vm1, %v709_v8  ;;  %v712_v11 = vld [vmem:[%s767_s21 + $0x58] sm:$0xff]   ;;  %v714_v13 = vld [vmem:[%s767_s21 + $0x60] sm:$0xff]   ;;  %v716_v15 = vld [vmem:[%s767_s21 + $0x68] sm:$0xff]  }
  0x14   : > { %674 = vmatprep.mubr.msk.bf16.mxu1 %vm280_vm1, %v710_v9  ;;  %v717_v16 = vld [vmem:[%s767_s21 + $0x30] sm:$0xff]   ;;  %v719_v18 = vld [vmem:[%s767_s21 + $0x38] sm:$0xff]  }
  0x15   : > { %v718_v17 = vld [vmem:[%s767_s21 + $0x70] sm:$0xff]   ;;  %v720_v19 = vld [vmem:[%s767_s21 + $0x78] sm:$0xff]  }
  0x1a   : > { %659 = vmatmul.mubr.msk.bf16.gmra.mrb[4].mxu0 %vm280_vm1, %v711_v10 }
  0x1b   : > { %675 = vmatmul.mubr.msk.bf16.gmra.mrb[4].mxu1 %vm280_vm1, %v712_v11  ;;  %662 = vmatprep.mubr.msk.bf16.mxu0 %vm280_vm1, %v713_v12 }
  0x1c   : > { %678 = vmatprep.mubr.msk.bf16.mxu1 %vm280_vm1, %v714_v13 }
  0x22   : > { %663 = vmatmul.mubr.msk.bf16.gmra.mrb[8].mxu0 %vm280_vm1, %v715_v14 }
  0x23   : > { %679 = vmatmul.mubr.msk.bf16.gmra.mrb[8].mxu1 %vm280_vm1, %v716_v15  ;;  %666 = vmatprep.mubr.msk.bf16.mxu0 %vm280_vm1, %v717_v16 }
  0x24   : > { %682 = vmatprep.mubr.msk.bf16.mxu1 %vm280_vm1, %v718_v17 }
  0x2a   : > { %667 = vmatmul.mubr.msk.bf16.gmra.mrb[12].mxu0 %vm280_vm1, %v719_v18 }
  0x2b   : > { %683 = vmatmul.mubr.msk.bf16.gmra.mrb[12].mxu1 %vm280_vm1, %v720_v19 }
  0xe5   : > { %v656_v20 = vpop.f32.mrb[0].mxu0 }
  0xe6   : > { %v672_v21 = vpop.f32.mrb[0].mxu1  ;;  %497 = vst.msk [vmem:[%s805_s25 + $0x10] sm:$0xff] %vm494_vm2, %v656_v20  ;;  %v367_v22 = vpop.f32.mrb[1].mxu0 }
  0xe7   : > { %513 = vst.msk [vmem:[%s805_s25 + $0x90] sm:$0xff] %vm494_vm2, %v672_v21  ;;  %v431_v23 = vpop.f32.mrb[1].mxu1  ;;  %495 = vst.msk [vmem:[%s805_s25] sm:$0xff] %vm494_vm2, %v367_v22  ;;  %v657_v24 = vpop.f32.mrb[2].mxu0 }
  0xe8   : > { %511 = vst.msk [vmem:[%s805_s25 + $0x80] sm:$0xff] %vm494_vm2, %v431_v23  ;;  %v673_v25 = vpop.f32.mrb[2].mxu1  ;;  %498 = vst.msk [vmem:[%s805_s25 + $0x18] sm:$0xff] %vm494_vm2, %v657_v24  ;;  %v370_v26 = vpop.f32.mrb[3].mxu0 }
  0xe9   : > { %514 = vst.msk [vmem:[%s805_s25 + $0x98] sm:$0xff] %vm494_vm2, %v673_v25  ;;  %v434_v27 = vpop.f32.mrb[3].mxu1  ;;  %496 = vst.msk [vmem:[%s805_s25 + $0x8] sm:$0xff] %vm494_vm2, %v370_v26 }
  0xea   : > { %512 = vst.msk [vmem:[%s805_s25 + $0x88] sm:$0xff] %vm494_vm2, %v434_v27 }
  0xed   : > { %v660_v28 = vpop.f32.mrb[4].mxu0 }
  0xee   : > { %v676_v29 = vpop.f32.mrb[4].mxu1  ;;  %501 = vst.msk [vmem:[%s805_s25 + $0x30] sm:$0xff] %vm494_vm2, %v660_v28  ;;  %v383_v30 = vpop.f32.mrb[5].mxu0 }
  0xef   : > { %517 = vst.msk [vmem:[%s805_s25 + $0xb0] sm:$0xff] %vm494_vm2, %v676_v29  ;;  %v447_v31 = vpop.f32.mrb[5].mxu1  ;;  %499 = vst.msk [vmem:[%s805_s25 + $0x20] sm:$0xff] %vm494_vm2, %v383_v30  ;;  %v661_v32 = vpop.f32.mrb[6].mxu0 }
  0xf0   : > { %515 = vst.msk [vmem:[%s805_s25 + $0xa0] sm:$0xff] %vm494_vm2, %v447_v31  ;;  %v677_v33 = vpop.f32.mrb[6].mxu1  ;;  %502 = vst.msk [vmem:[%s805_s25 + $0x38] sm:$0xff] %vm494_vm2, %v661_v32  ;;  %v386_v34 = vpop.f32.mrb[7].mxu0 }
  0xf1   : > { %518 = vst.msk [vmem:[%s805_s25 + $0xb8] sm:$0xff] %vm494_vm2, %v677_v33  ;;  %v450_v35 = vpop.f32.mrb[7].mxu1  ;;  %500 = vst.msk [vmem:[%s805_s25 + $0x28] sm:$0xff] %vm494_vm2, %v386_v34 }
  0xf2   : > { %516 = vst.msk [vmem:[%s805_s25 + $0xa8] sm:$0xff] %vm494_vm2, %v450_v35 }
  0xf5   : > { %v664_v36 = vpop.f32.mrb[8].mxu0 }
  0xf6   : > { %v680_v37 = vpop.f32.mrb[8].mxu1  ;;  %505 = vst.msk [vmem:[%s805_s25 + $0x50] sm:$0xff] %vm494_vm2, %v664_v36  ;;  %v399_v38 = vpop.f32.mrb[9].mxu0 }
  0xf7   : > { %521 = vst.msk [vmem:[%s805_s25 + $0xd0] sm:$0xff] %vm494_vm2, %v680_v37  ;;  %v463_v39 = vpop.f32.mrb[9].mxu1  ;;  %503 = vst.msk [vmem:[%s805_s25 + $0x40] sm:$0xff] %vm494_vm2, %v399_v38  ;;  %v665_v40 = vpop.f32.mrb[10].mxu0 }
  0xf8   : > { %519 = vst.msk [vmem:[%s805_s25 + $0xc0] sm:$0xff] %vm494_vm2, %v463_v39  ;;  %v681_v41 = vpop.f32.mrb[10].mxu1  ;;  %506 = vst.msk [vmem:[%s805_s25 + $0x58] sm:$0xff] %vm494_vm2, %v665_v40  ;;  %v402_v42 = vpop.f32.mrb[11].mxu0 }
  0xf9   : > { %522 = vst.msk [vmem:[%s805_s25 + $0xd8] sm:$0xff] %vm494_vm2, %v681_v41  ;;  %v466_v43 = vpop.f32.mrb[11].mxu1  ;;  %504 = vst.msk [vmem:[%s805_s25 + $0x48] sm:$0xff] %vm494_vm2, %v402_v42 }
  0xfa   : > { %520 = vst.msk [vmem:[%s805_s25 + $0xc8] sm:$0xff] %vm494_vm2, %v466_v43 }
  0xfd   : > { %v668_v44 = vpop.f32.mrb[12].mxu0 }
  0xfe   : > { %v684_v45 = vpop.f32.mrb[12].mxu1  ;;  %509 = vst.msk [vmem:[%s805_s25 + $0x70] sm:$0xff] %vm494_vm2, %v668_v44  ;;  %v415_v46 = vpop.f32.mrb[13].mxu0 }
  0xff   : > { %525 = vst.msk [vmem:[%s805_s25 + $0xf0] sm:$0xff] %vm494_vm2, %v684_v45  ;;  %v479_v47 = vpop.f32.mrb[13].mxu1  ;;  %507 = vst.msk [vmem:[%s805_s25 + $0x60] sm:$0xff] %vm494_vm2, %v415_v46  ;;  %v669_v48 = vpop.f32.mrb[14].mxu0 }
 0x100   : > { %523 = vst.msk [vmem:[%s805_s25 + $0xe0] sm:$0xff] %vm494_vm2, %v479_v47  ;;  %v685_v49 = vpop.f32.mrb[14].mxu1  ;;  %510 = vst.msk [vmem:[%s805_s25 + $0x78] sm:$0xff] %vm494_vm2, %v669_v48  ;;  %v418_v50 = vpop.f32.mrb[15].mxu0 }
 0x101   : > { %526 = vst.msk [vmem:[%s805_s25 + $0xf8] sm:$0xff] %vm494_vm2, %v685_v49  ;;  %v482_v51 = vpop.f32.mrb[15].mxu1  ;;  %508 = vst.msk [vmem:[%s805_s25 + $0x68] sm:$0xff] %vm494_vm2, %v418_v50 }
 0x102   : > { %524 = vst.msk [vmem:[%s805_s25 + $0xe8] sm:$0xff] %vm494_vm2, %v482_v51 }
 0x103 PF: > { %s12_s9 = sadd.s32 1, %s727_s9  }
 0x104   : > { %p9_p4 = scmp.ge.s32.totalorder %s12_s9, 4  }
 0x106   :  { %11 = sbr.rel (!%p9_p4) target bundleno = 1 (0x1), region = 58 }

// kernel: decoder_block_v1_forward.5
= control target key start
LH: loop header
LB: loop body
LE: loop exit
PB: predicated region body
PF: predicated region fallthrough
CT: control target
= control target key end

     0   :  { %s454_s12 = smov 0   ;;  %s645_s0 = inlined_call_operand.vmem [shape: f32[512,16], index: 0, kind: input, shape index: {}]   ;;  %s646_s1 = inlined_call_operand.vmem [shape: f32[1,16], index: 1, kind: input, shape index: {}]   ;;  %s647_s2 = inlined_call_operand.vmem [shape: f32[1,16], index: 2, kind: input, shape index: {}]   ;;  %s648_s3 = inlined_call_operand.vmem [shape: f32[512,16], index: 3, kind: output, shape index: {}]  }
   0x1 LB: > { %s405_s13 = sadd.s32 4294967295, %s432_s12   ;;  %p409_p0 = scmp.ge.s32.totalorder %s432_s12, 1  ;;  %s432_s12 = sphi %s454_s12, %s13_s12  }
   0x2   : > { %p138_p1 = scmp.lt.s32.totalorder %s432_s12, 3 }
   0x4   : > { %p139_p2 = pnand %p409_p0, %p138_p1 }
   0x5   : > { %s410_s14 = sshll.u32 (!%p139_p2), %s405_s13, 5  ;;  %v465_v0 = vld [vmem:[%s646_s1] ss:$0 sm:$0xff] (!%p139_p2)  ;;  %vm316_vm0 = vcmask (!%p139_p2), 130048  }
   0x6   : > { %142 = sbr.rel (%p139_p2) target bundleno = 46 (0x2e), region = 32  ;;  %p163_p3 = scmp.lt.s32.totalorder (!%p139_p2), %s410_s14, 63  ;;  %v475_v1 = vld [vmem:[%s647_s2] ss:$0 sm:$0xff] (!%p139_p2) }
   0xd   : > { %s650_s14 = smov (!%p163_p3, %s410_s14), 63 }
   0xe   : > { %s411_s15 = sshll.u32 %s650_s14, 3 }
   0xf   : > { %s470_s20 = scalar_lea.vmem %s645_s0, %s411_s15  ;;  %s498_s25 = scalar_lea.vmem %s648_s3, %s411_s15 }
  0x10   : > { %v174_v2 = vld [vmem:[%s470_s20] sm:$0xff]  ;;  %v175_v3 = vld [vmem:[%s470_s20 + $0x8] sm:$0xff]  ;;  %v176_v4 = vld [vmem:[%s470_s20 + $0x10] sm:$0xff] }
  0x11   : > { %v213_v5 = vmul.f32 %v465_v0, %v174_v2  ;;  %v214_v6 = vmul.f32 %v465_v0, %v175_v3  ;;  %v215_v7 = vmul.f32 %v465_v0, %v176_v4  ;;  %v177_v8 = vld [vmem:[%s470_s20 + $0x18] sm:$0xff]  ;;  %v178_v9 = vld [vmem:[%s470_s20 + $0x20] sm:$0xff]  ;;  %v179_v10 = vld [vmem:[%s470_s20 + $0x28] sm:$0xff] }
  0x12   : > { %v216_v11 = vmul.f32 %v465_v0, %v177_v8  ;;  %v217_v12 = vmul.f32 %v465_v0, %v178_v9  ;;  %v218_v13 = vmul.f32 %v465_v0, %v179_v10  ;;  %v180_v14 = vld [vmem:[%s470_s20 + $0x30] sm:$0xff]  ;;  %v181_v15 = vld [vmem:[%s470_s20 + $0x38] sm:$0xff]  ;;  %v182_v24 = vld [vmem:[%s470_s20 + $0x40] sm:$0xff] }
  0x13   : > { %v252_v16 = vadd.f32 %v475_v1, %v213_v5  ;;  %v253_v17 = vadd.f32 %v475_v1, %v214_v6  ;;  %v254_v18 = vadd.f32 %v475_v1, %v215_v7  ;;  %v219_v19 = vmul.f32 %v465_v0, %v180_v14  ;;  %v183_v25 = vld [vmem:[%s470_s20 + $0x48] sm:$0xff]  ;;  %v184_v26 = vld [vmem:[%s470_s20 + $0x50] sm:$0xff]  ;;  %v185_v31 = vld [vmem:[%s470_s20 + $0x58] sm:$0xff] }
  0x14   : > { %v255_v20 = vadd.f32 %v475_v1, %v216_v11  ;;  %v256_v21 = vadd.f32 %v475_v1, %v217_v12  ;;  %v257_v22 = vadd.f32 %v475_v1, %v218_v13  ;;  %v220_v23 = vmul.f32 %v465_v0, %v181_v15  ;;  %v186_v32 = vld [vmem:[%s470_s20 + $0x60] sm:$0xff]  ;;  %v187_v33 = vld [vmem:[%s470_s20 + $0x68] sm:$0xff]  ;;  %v188_v38 = vld [vmem:[%s470_s20 + $0x70] sm:$0xff] }
  0x15   : > { %v284_v27 = vmax.f32 %v252_v16, 0.0  ;;  %v285_v28 = vmax.f32 %v253_v17, 0.0  ;;  %v286_v29 = vmax.f32 %v254_v18, 0.0  ;;  %v258_v30 = vadd.f32 %v475_v1, %v219_v19  ;;  %v189_v43 = vld [vmem:[%s470_s20 + $0x78] sm:$0xff]  ;;  %v190_v56 = vld [vmem:[%s470_s20 + $0x80] sm:$0xff]  ;;  %v191_v57 = vld [vmem:[%s470_s20 + $0x88] sm:$0xff] }
  0x16   : > { %v287_v34 = vmax.f32 %v255_v20, 0.0  ;;  %v288_v35 = vmax.f32 %v256_v21, 0.0  ;;  %v289_v36 = vmax.f32 %v257_v22, 0.0  ;;  %v259_v37 = vadd.f32 %v475_v1, %v220_v23  ;;  %v192_v58 = vld [vmem:[%s470_s20 + $0x90] sm:$0xff]  ;;  %v193_v63 = vld [vmem:[%s470_s20 + $0x98] sm:$0xff]  ;;  %v194_v2 = vld [vmem:[%s470_s20 + $0xa0] sm:$0xff] }
  0x17   : > { %317 = vst.msk [vmem:[%s498_s25] sm:$0xff] %vm316_vm0, %v284_v27  ;;  %318 = vst.msk [vmem:[%s498_s25 + $0x8] sm:$0xff] %vm316_vm0, %v285_v28  ;;  %v290_v39 = vmax.f32 %v258_v30, 0.0  ;;  %v221_v40 = vmul.f32 %v465_v0, %v182_v24  ;;  %v222_v41 = vmul.f32 %v465_v0, %v183_v25  ;;  %v223_v42 = vmul.f32 %v465_v0, %v184_v26  ;;  %v195_v3 = vld [vmem:[%s470_s20 + $0xa8] sm:$0xff]  ;;  %v196_v8 = vld [vmem:[%s470_s20 + $0xb0] sm:$0xff] }
  0x18   : > { %319 = vst.msk [vmem:[%s498_s25 + $0x10] sm:$0xff] %vm316_vm0, %v286_v29  ;;  %320 = vst.msk [vmem:[%s498_s25 + $0x18] sm:$0xff] %vm316_vm0, %v287_v34  ;;  %v291_v44 = vmax.f32 %v259_v37, 0.0  ;;  %v224_v45 = vmul.f32 %v465_v0, %v185_v31  ;;  %v225_v46 = vmul.f32 %v465_v0, %v186_v32  ;;  %v226_v47 = vmul.f32 %v465_v0, %v187_v33  ;;  %v197_v13 = vld [vmem:[%s470_s20 + $0xb8] sm:$0xff]  ;;  %v198_v26 = vld [vmem:[%s470_s20 + $0xc0] sm:$0xff] }
  0x19   : > { %321 = vst.msk [vmem:[%s498_s25 + $0x20] sm:$0xff] %vm316_vm0, %v288_v35  ;;  %322 = vst.msk [vmem:[%s498_s25 + $0x28] sm:$0xff] %vm316_vm0, %v289_v36  ;;  %v260_v48 = vadd.f32 %v475_v1, %v221_v40  ;;  %v261_v49 = vadd.f32 %v475_v1, %v222_v41  ;;  %v262_v50 = vadd.f32 %v475_v1, %v223_v42  ;;  %v199_v27 = vld [vmem:[%s470_s20 + $0xc8] sm:$0xff]  ;;  %v200_v28 = vld [vmem:[%s470_s20 + $0xd0] sm:$0xff] }
  0x1a   : > { %323 = vst.msk [vmem:[%s498_s25 + $0x30] sm:$0xff] %vm316_vm0, %v290_v39  ;;  %v227_v51 = vmul.f32 %v465_v0, %v188_v38  ;;  %324 = vst.msk [vmem:[%s498_s25 + $0x38] sm:$0xff] %vm316_vm0, %v291_v44  ;;  %v263_v52 = vadd.f32 %v475_v1, %v224_v45  ;;  %v264_v53 = vadd.f32 %v475_v1, %v225_v46  ;;  %v201_v33 = vld [vmem:[%s470_s20 + $0xd8] sm:$0xff]  ;;  %v202_v34 = vld [vmem:[%s470_s20 + $0xe0] sm:$0xff] }
  0x1b   : > { %v265_v54 = vadd.f32 %v475_v1, %v226_v47  ;;  %v228_v55 = vmul.f32 %v465_v0, %v189_v43  ;;  %v292_v59 = vmax.f32 %v260_v48, 0.0  ;;  %v293_v60 = vmax.f32 %v261_v49, 0.0  ;;  %v203_v35 = vld [vmem:[%s470_s20 + $0xe8] sm:$0xff]  ;;  %v204_v40 = vld [vmem:[%s470_s20 + $0xf0] sm:$0xff]  ;;  %v205_v45 = vld [vmem:[%s470_s20 + $0xf8] sm:$0xff] }
  0x1c   : > { %v294_v61 = vmax.f32 %v262_v50, 0.0  ;;  %v266_v62 = vadd.f32 %v475_v1, %v227_v51  ;;  %v295_v4 = vmax.f32 %v263_v52, 0.0  ;;  %v296_v5 = vmax.f32 %v264_v53, 0.0 }
  0x1d   : > { %v297_v6 = vmax.f32 %v265_v54, 0.0  ;;  %v267_v7 = vadd.f32 %v475_v1, %v228_v55  ;;  %325 = vst.msk [vmem:[%s498_s25 + $0x40] sm:$0xff] %vm316_vm0, %v292_v59  ;;  %326 = vst.msk [vmem:[%s498_s25 + $0x48] sm:$0xff] %vm316_vm0, %v293_v60  ;;  %v229_v10 = vmul.f32 %v465_v0, %v190_v56  ;;  %v230_v11 = vmul.f32 %v465_v0, %v191_v57 }
  0x1e   : > { %327 = vst.msk [vmem:[%s498_s25 + $0x50] sm:$0xff] %vm316_vm0, %v294_v61  ;;  %v298_v9 = vmax.f32 %v266_v62, 0.0  ;;  %v231_v12 = vmul.f32 %v465_v0, %v192_v58  ;;  %328 = vst.msk [vmem:[%s498_s25 + $0x58] sm:$0xff] %vm316_vm0, %v295_v4  ;;  %v232_v15 = vmul.f32 %v465_v0, %v193_v63  ;;  %v233_v16 = vmul.f32 %v465_v0, %v194_v2 }
  0x1f   : > { %329 = vst.msk [vmem:[%s498_s25 + $0x60] sm:$0xff] %vm316_vm0, %v296_v5  ;;  %330 = vst.msk [vmem:[%s498_s25 + $0x68] sm:$0xff] %vm316_vm0, %v297_v6  ;;  %v299_v14 = vmax.f32 %v267_v7, 0.0  ;;  %v234_v17 = vmul.f32 %v465_v0, %v195_v3  ;;  %v268_v18 = vadd.f32 %v475_v1, %v229_v10  ;;  %v269_v19 = vadd.f32 %v475_v1, %v230_v11 }
  0x20   : > { %331 = vst.msk [vmem:[%s498_s25 + $0x70] sm:$0xff] %vm316_vm0, %v298_v9  ;;  %v270_v20 = vadd.f32 %v475_v1, %v231_v12  ;;  %v235_v21 = vmul.f32 %v465_v0, %v196_v8  ;;  %v271_v22 = vadd.f32 %v475_v1, %v232_v15  ;;  %v272_v23 = vadd.f32 %v475_v1, %v233_v16 }
  0x21   : > { %332 = vst.msk [vmem:[%s498_s25 + $0x78] sm:$0xff] %vm316_vm0, %v299_v14  ;;  %v273_v24 = vadd.f32 %v475_v1, %v234_v17  ;;  %v236_v25 = vmul.f32 %v465_v0, %v197_v13  ;;  %v300_v29 = vmax.f32 %v268_v18, 0.0  ;;  %v301_v30 = vmax.f32 %v269_v19, 0.0 }
  0x22   : > { %v302_v31 = vmax.f32 %v270_v20, 0.0  ;;  %v274_v32 = vadd.f32 %v475_v1, %v235_v21  ;;  %v303_v36 = vmax.f32 %v271_v22, 0.0  ;;  %v304_v37 = vmax.f32 %v272_v23, 0.0 }
  0x23   : > { %v305_v38 = vmax.f32 %v273_v24, 0.0  ;;  %v275_v39 = vadd.f32 %v475_v1, %v236_v25  ;;  %333 = vst.msk [vmem:[%s498_s25 + $0x80] sm:$0xff] %vm316_vm0, %v300_v29  ;;  %334 = vst.msk [vmem:[%s498_s25 + $0x88] sm:$0xff] %vm316_vm0, %v301_v30  ;;  %v237_v42 = vmul.f32 %v465_v0, %v198_v26  ;;  %v238_v43 = vmul.f32 %v465_v0, %v199_v27 }
  0x24   : > { %335 = vst.msk [vmem:[%s498_s25 + $0x90] sm:$0xff] %vm316_vm0, %v302_v31  ;;  %v306_v41 = vmax.f32 %v274_v32, 0.0  ;;  %v239_v44 = vmul.f32 %v465_v0, %v200_v28  ;;  %336 = vst.msk [vmem:[%s498_s25 + $0x98] sm:$0xff] %vm316_vm0, %v303_v36  ;;  %v240_v47 = vmul.f32 %v465_v0, %v201_v33  ;;  %v241_v48 = vmul.f32 %v465_v0, %v202_v34 }
  0x25   : > { %337 = vst.msk [vmem:[%s498_s25 + $0xa0] sm:$0xff] %vm316_vm0, %v304_v37  ;;  %338 = vst.msk [vmem:[%s498_s25 + $0xa8] sm:$0xff] %vm316_vm0, %v305_v38  ;;  %v307_v46 = vmax.f32 %v275_v39, 0.0  ;;  %v242_v49 = vmul.f32 %v465_v0, %v203_v35  ;;  %v276_v50 = vadd.f32 %v475_v1, %v237_v42  ;;  %v277_v51 = vadd.f32 %v475_v1, %v238_v43 }
  0x26   : > { %339 = vst.msk [vmem:[%s498_s25 + $0xb0] sm:$0xff] %vm316_vm0, %v306_v41  ;;  %v278_v52 = vadd.f32 %v475_v1, %v239_v44  ;;  %v243_v53 = vmul.f32 %v465_v0, %v204_v40  ;;  %v279_v54 = vadd.f32 %v475_v1, %v240_v47  ;;  %v280_v55 = vadd.f32 %v475_v1, %v241_v48 }
  0x27   : > { %340 = vst.msk [vmem:[%s498_s25 + $0xb8] sm:$0xff] %vm316_vm0, %v307_v46  ;;  %v281_v56 = vadd.f32 %v475_v1, %v242_v49  ;;  %v244_v57 = vmul.f32 %v465_v0, %v205_v45  ;;  %v308_v58 = vmax.f32 %v276_v50, 0.0  ;;  %v309_v59 = vmax.f32 %v277_v51, 0.0 }
  0x28   : > { %v310_v60 = vmax.f32 %v278_v52, 0.0  ;;  %v282_v61 = vadd.f32 %v475_v1, %v243_v53  ;;  %v311_v62 = vmax.f32 %v279_v54, 0.0  ;;  %v312_v63 = vmax.f32 %v280_v55, 0.0 }
  0x29   : > { %v313_v2 = vmax.f32 %v281_v56, 0.0  ;;  %v283_v3 = vadd.f32 %v475_v1, %v244_v57  ;;  %341 = vst.msk [vmem:[%s498_s25 + $0xc0] sm:$0xff] %vm316_vm0, %v308_v58  ;;  %342 = vst.msk [vmem:[%s498_s25 + $0xc8] sm:$0xff] %vm316_vm0, %v309_v59 }
  0x2a   : > { %343 = vst.msk [vmem:[%s498_s25 + $0xd0] sm:$0xff] %vm316_vm0, %v310_v60  ;;  %v314_v4 = vmax.f32 %v282_v61, 0.0  ;;  %344 = vst.msk [vmem:[%s498_s25 + $0xd8] sm:$0xff] %vm316_vm0, %v311_v62 }
  0x2b   : > { %345 = vst.msk [vmem:[%s498_s25 + $0xe0] sm:$0xff] %vm316_vm0, %v312_v63  ;;  %346 = vst.msk [vmem:[%s498_s25 + $0xe8] sm:$0xff] %vm316_vm0, %v313_v2  ;;  %v315_v0 = vmax.f32 %v283_v3, 0.0 }
  0x2c   : > { %347 = vst.msk [vmem:[%s498_s25 + $0xf0] sm:$0xff] %vm316_vm0, %v314_v4 }
  0x2d   : > { %348 = vst.msk [vmem:[%s498_s25 + $0xf8] sm:$0xff] %vm316_vm0, %v315_v0 }
  0x2e PF: > { %s13_s12 = sadd.s32 1, %s432_s12  }
  0x2f   : > { %p10_p4 = scmp.ge.s32.totalorder %s13_s12, 4  }
  0x31   :  { %12 = sbr.rel (!%p10_p4) target bundleno = 1 (0x1), region = 62 }

// kernel: decoder_block_v1_forward.6
= control target key start
LH: loop header
LB: loop body
LE: loop exit
PB: predicated region body
PF: predicated region fallthrough
CT: control target
= control target key end

     0   :  { %s757_s9 = smov 0   ;;  %s890_s0 = inlined_call_operand.vmem [shape: bf16[512,64], index: 0, kind: input, shape index: {}]   ;;  %s891_s1 = inlined_call_operand.vmem [shape: bf16[64,32], index: 1, kind: input, shape index: {}]   ;;  %s892_s2 = inlined_call_operand.vmem [shape: f32[512,32], index: 2, kind: output, shape index: {}]  }
   0x1 LB: > { %s591_s10 = sadd.s32 4294967295, %s740_s9   ;;  %p595_p0 = scmp.ge.s32.totalorder %s740_s9, 1  ;;  %s740_s9 = sphi %s757_s9, %s12_s9  }
   0x2   : > { %p113_p1 = scmp.lt.s32.totalorder %s740_s9, 3 }
   0x4   : > { %p114_p2 = pnand %p595_p0, %p113_p1 }
   0x5   : > { %v714_v0 = vld [vmem:[%s891_s1] sm:$0xff] (!%p114_p2)   ;;  %s596_s13 = sshll.u32 (!%p114_p2), %s591_s10, 5  ;;  %v715_v1 = vld [vmem:[%s891_s1 + $0x8] sm:$0xff] (!%p114_p2)   ;;  %v716_v2 = vld [vmem:[%s891_s1 + $0x10] sm:$0xff] (!%p114_p2)   ;;  %vm292_vm0 = vcmask (!%p114_p2), 523264   ;;  %vm502_vm1 = vcmask (!%p114_p2), 261120  }
   0x6   : > { %117 = sbr.rel (%p114_p2) target bundleno = 262 (0x106), region = 28  ;;  %p136_p3 = scmp.lt.s32.totalorder (!%p114_p2), %s596_s13, 63  ;;  %658 = vmatprep.subr.bf16.mxu0 (!%p114_p2), %v714_v0  ;;  %698 = vmatprep.subr.bf16.mxu1 (!%p114_p2), %v714_v0  ;;  %v717_v3 = vld [vmem:[%s891_s1 + $0x18] sm:$0xff] (!%p114_p2)  }
   0x7   : > { %659 = vmatpush3.bf16.msra.mxu0 (!%p114_p2), %v714_v0  ;;  %702 = vmatpush3.bf16.msra.mxu1 (!%p114_p2), %v714_v0 }
   0x8   : > { %660 = vmatprep.subr.bf16.mxu0 (!%p114_p2), %v715_v1  ;;  %699 = vmatprep.subr.bf16.mxu1 (!%p114_p2), %v715_v1 }
   0xb   : > { %661 = vmatpush3.bf16.msra.mxu0 (!%p114_p2), %v715_v1  ;;  %703 = vmatpush3.bf16.msra.mxu1 (!%p114_p2), %v715_v1 }
   0xc   : > { %662 = vmatprep.subr.bf16.mxu0 (!%p114_p2), %v716_v2  ;;  %700 = vmatprep.subr.bf16.mxu1 (!%p114_p2), %v716_v2 }
   0xd   : > { %s894_s13 = smov (!%p136_p3, %s596_s13), 63 }
   0xe   : > { %s597_s18 = sshll.u32 %s894_s13, 2  ;;  %s599_s24 = sshll.u32 %s894_s13, 3 }
   0xf   : > { %s783_s23 = scalar_lea.vmem %s890_s0, %s597_s18  ;;  %663 = vmatpush3.bf16.msra.mxu0 %v716_v2  ;;  %704 = vmatpush3.bf16.msra.mxu1 %v716_v2  ;;  %s821_s27 = scalar_lea.vmem %s892_s2, %s599_s24 }
  0x10   : > { %v718_v4 = vld [vmem:[%s783_s23] sm:$0xff]   ;;  %664 = vmatprep.subr.bf16.mxu0 %v717_v3  ;;  %701 = vmatprep.subr.bf16.mxu1 %v717_v3  ;;  %v720_v6 = vld [vmem:[%s783_s23 + $0x8] sm:$0xff]   ;;  %v722_v8 = vld [vmem:[%s783_s23 + $0x10] sm:$0xff]  }
  0x11   : > { %v719_v5 = vld [vmem:[%s783_s23 + $0x40] sm:$0xff]   ;;  %666 = vmatprep.mubr.msk.bf16.mxu0 %vm292_vm0, %v718_v4  ;;  %v721_v7 = vld [vmem:[%s783_s23 + $0x48] sm:$0xff]   ;;  %v723_v9 = vld [vmem:[%s783_s23 + $0x50] sm:$0xff]  }
  0x12   : > { %682 = vmatprep.mubr.msk.bf16.mxu1 %vm292_vm0, %v719_v5  ;;  %v724_v10 = vld [vmem:[%s783_s23 + $0x18] sm:$0xff]   ;;  %v726_v12 = vld [vmem:[%s783_s23 + $0x20] sm:$0xff]   ;;  %v728_v14 = vld [vmem:[%s783_s23 + $0x28] sm:$0xff]  }
  0x13   : > { %665 = vmatpush3.bf16.msra.mxu0 %v717_v3  ;;  %705 = vmatpush3.bf16.msra.mxu1 %v717_v3  ;;  %v725_v11 = vld [vmem:[%s783_s23 + $0x58] sm:$0xff]   ;;  %v727_v13 = vld [vmem:[%s783_s23 + $0x60] sm:$0xff]   ;;  %v729_v15 = vld [vmem:[%s783_s23 + $0x68] sm:$0xff]  }
  0x14   : > { %v730_v16 = vld [vmem:[%s783_s23 + $0x30] sm:$0xff]   ;;  %v732_v18 = vld [vmem:[%s783_s23 + $0x38] sm:$0xff]  }
  0x15   : > { %v731_v17 = vld [vmem:[%s783_s23 + $0x70] sm:$0xff]   ;;  %v733_v19 = vld [vmem:[%s783_s23 + $0x78] sm:$0xff]  }
  0x16   : > { %667 = vmatmul.mubr.msk.bf16.vlgmr.msra.gmra.mrb[0].mxu0 %vm292_vm0, %v720_v6  ;;  %683 = vmatmul.mubr.msk.bf16.vlgmr.msra.gmra.mrb[0].mxu1 %vm292_vm0, %v721_v7 }
  0x17   : > { %670 = vmatprep.mubr.msk.bf16.mxu0 %vm292_vm0, %v722_v8  ;;  %686 = vmatprep.mubr.msk.bf16.mxu1 %vm292_vm0, %v723_v9 }
  0x1e   : > { %671 = vmatmul.mubr.msk.bf16.gmra.mrb[4].mxu0 %vm292_vm0, %v724_v10  ;;  %687 = vmatmul.mubr.msk.bf16.gmra.mrb[4].mxu1 %vm292_vm0, %v725_v11 }
  0x1f   : > { %674 = vmatprep.mubr.msk.bf16.mxu0 %vm292_vm0, %v726_v12  ;;  %690 = vmatprep.mubr.msk.bf16.mxu1 %vm292_vm0, %v727_v13 }
  0x26   : > { %675 = vmatmul.mubr.msk.bf16.gmra.mrb[8].mxu0 %vm292_vm0, %v728_v14  ;;  %691 = vmatmul.mubr.msk.bf16.gmra.mrb[8].mxu1 %vm292_vm0, %v729_v15 }
  0x27   : > { %678 = vmatprep.mubr.msk.bf16.mxu0 %vm292_vm0, %v730_v16  ;;  %694 = vmatprep.mubr.msk.bf16.mxu1 %vm292_vm0, %v731_v17 }
  0x2e   : > { %679 = vmatmul.mubr.msk.bf16.gmra.mrb[12].mxu0 %vm292_vm0, %v732_v18  ;;  %695 = vmatmul.mubr.msk.bf16.gmra.mrb[12].mxu1 %vm292_vm0, %v733_v19 }
  0xe9   : > { %v668_v20 = vpop.f32.mrb[0].mxu0  ;;  %v684_v21 = vpop.f32.mrb[0].mxu1 }
  0xea   : > { %505 = vst.msk [vmem:[%s821_s27 + $0x10] sm:$0xff] %vm502_vm1, %v668_v20  ;;  %521 = vst.msk [vmem:[%s821_s27 + $0x90] sm:$0xff] %vm502_vm1, %v684_v21  ;;  %v375_v22 = vpop.f32.mrb[1].mxu0  ;;  %v439_v23 = vpop.f32.mrb[1].mxu1 }
  0xeb   : > { %503 = vst.msk [vmem:[%s821_s27] sm:$0xff] %vm502_vm1, %v375_v22  ;;  %519 = vst.msk [vmem:[%s821_s27 + $0x80] sm:$0xff] %vm502_vm1, %v439_v23  ;;  %v669_v24 = vpop.f32.mrb[2].mxu0  ;;  %v685_v25 = vpop.f32.mrb[2].mxu1 }
  0xec   : > { %506 = vst.msk [vmem:[%s821_s27 + $0x18] sm:$0xff] %vm502_vm1, %v669_v24  ;;  %522 = vst.msk [vmem:[%s821_s27 + $0x98] sm:$0xff] %vm502_vm1, %v685_v25  ;;  %v378_v26 = vpop.f32.mrb[3].mxu0  ;;  %v442_v27 = vpop.f32.mrb[3].mxu1 }
  0xed   : > { %504 = vst.msk [vmem:[%s821_s27 + $0x8] sm:$0xff] %vm502_vm1, %v378_v26  ;;  %520 = vst.msk [vmem:[%s821_s27 + $0x88] sm:$0xff] %vm502_vm1, %v442_v27 }
  0xf1   : > { %v672_v28 = vpop.f32.mrb[4].mxu0  ;;  %v688_v29 = vpop.f32.mrb[4].mxu1 }
  0xf2   : > { %509 = vst.msk [vmem:[%s821_s27 + $0x30] sm:$0xff] %vm502_vm1, %v672_v28  ;;  %525 = vst.msk [vmem:[%s821_s27 + $0xb0] sm:$0xff] %vm502_vm1, %v688_v29  ;;  %v391_v30 = vpop.f32.mrb[5].mxu0  ;;  %v455_v31 = vpop.f32.mrb[5].mxu1 }
  0xf3   : > { %507 = vst.msk [vmem:[%s821_s27 + $0x20] sm:$0xff] %vm502_vm1, %v391_v30  ;;  %523 = vst.msk [vmem:[%s821_s27 + $0xa0] sm:$0xff] %vm502_vm1, %v455_v31  ;;  %v673_v32 = vpop.f32.mrb[6].mxu0  ;;  %v689_v33 = vpop.f32.mrb[6].mxu1 }
  0xf4   : > { %510 = vst.msk [vmem:[%s821_s27 + $0x38] sm:$0xff] %vm502_vm1, %v673_v32  ;;  %526 = vst.msk [vmem:[%s821_s27 + $0xb8] sm:$0xff] %vm502_vm1, %v689_v33  ;;  %v394_v34 = vpop.f32.mrb[7].mxu0  ;;  %v458_v35 = vpop.f32.mrb[7].mxu1 }
  0xf5   : > { %508 = vst.msk [vmem:[%s821_s27 + $0x28] sm:$0xff] %vm502_vm1, %v394_v34  ;;  %524 = vst.msk [vmem:[%s821_s27 + $0xa8] sm:$0xff] %vm502_vm1, %v458_v35 }
  0xf9   : > { %v676_v36 = vpop.f32.mrb[8].mxu0  ;;  %v692_v37 = vpop.f32.mrb[8].mxu1 }
  0xfa   : > { %513 = vst.msk [vmem:[%s821_s27 + $0x50] sm:$0xff] %vm502_vm1, %v676_v36  ;;  %529 = vst.msk [vmem:[%s821_s27 + $0xd0] sm:$0xff] %vm502_vm1, %v692_v37  ;;  %v407_v38 = vpop.f32.mrb[9].mxu0  ;;  %v471_v39 = vpop.f32.mrb[9].mxu1 }
  0xfb   : > { %511 = vst.msk [vmem:[%s821_s27 + $0x40] sm:$0xff] %vm502_vm1, %v407_v38  ;;  %527 = vst.msk [vmem:[%s821_s27 + $0xc0] sm:$0xff] %vm502_vm1, %v471_v39  ;;  %v677_v40 = vpop.f32.mrb[10].mxu0  ;;  %v693_v41 = vpop.f32.mrb[10].mxu1 }
  0xfc   : > { %514 = vst.msk [vmem:[%s821_s27 + $0x58] sm:$0xff] %vm502_vm1, %v677_v40  ;;  %530 = vst.msk [vmem:[%s821_s27 + $0xd8] sm:$0xff] %vm502_vm1, %v693_v41  ;;  %v410_v42 = vpop.f32.mrb[11].mxu0  ;;  %v474_v43 = vpop.f32.mrb[11].mxu1 }
  0xfd   : > { %512 = vst.msk [vmem:[%s821_s27 + $0x48] sm:$0xff] %vm502_vm1, %v410_v42  ;;  %528 = vst.msk [vmem:[%s821_s27 + $0xc8] sm:$0xff] %vm502_vm1, %v474_v43 }
 0x101   : > { %v680_v44 = vpop.f32.mrb[12].mxu0  ;;  %v696_v45 = vpop.f32.mrb[12].mxu1 }
 0x102   : > { %517 = vst.msk [vmem:[%s821_s27 + $0x70] sm:$0xff] %vm502_vm1, %v680_v44  ;;  %533 = vst.msk [vmem:[%s821_s27 + $0xf0] sm:$0xff] %vm502_vm1, %v696_v45  ;;  %v423_v46 = vpop.f32.mrb[13].mxu0  ;;  %v487_v47 = vpop.f32.mrb[13].mxu1 }
 0x103   : > { %515 = vst.msk [vmem:[%s821_s27 + $0x60] sm:$0xff] %vm502_vm1, %v423_v46  ;;  %531 = vst.msk [vmem:[%s821_s27 + $0xe0] sm:$0xff] %vm502_vm1, %v487_v47  ;;  %v681_v48 = vpop.f32.mrb[14].mxu0  ;;  %v697_v49 = vpop.f32.mrb[14].mxu1 }
 0x104   : > { %518 = vst.msk [vmem:[%s821_s27 + $0x78] sm:$0xff] %vm502_vm1, %v681_v48  ;;  %534 = vst.msk [vmem:[%s821_s27 + $0xf8] sm:$0xff] %vm502_vm1, %v697_v49  ;;  %v426_v50 = vpop.f32.mrb[15].mxu0  ;;  %v490_v51 = vpop.f32.mrb[15].mxu1 }
 0x105   : > { %516 = vst.msk [vmem:[%s821_s27 + $0x68] sm:$0xff] %vm502_vm1, %v426_v50  ;;  %532 = vst.msk [vmem:[%s821_s27 + $0xe8] sm:$0xff] %vm502_vm1, %v490_v51 }
 0x106 PF: > { %s12_s9 = sadd.s32 1, %s740_s9  }
 0x107   : > { %p9_p4 = scmp.ge.s32.totalorder %s12_s9, 4  }
 0x109   :  { %11 = sbr.rel (!%p9_p4) target bundleno = 1 (0x1), region = 58 }

// kernel: tile.17
= control target key start
LH: loop header
LB: loop body
LE: loop exit
PB: predicated region body
PF: predicated region fallthrough
CT: control target
= control target key end

     0   :  { %s22_s0 = inlined_call_operand.vmem [shape: f32[8], index: 0, kind: input, shape index: {}]   ;;  %s23_s1 = inlined_call_operand.vmem [shape: f32[4,8], index: 1, kind: output, shape index: {}]  }
   0x1   :  { %v4_v0 = vld [vmem:[%s22_s0] ss:$0 sm:$0xff] }
   0x2   :  { %5 = vst [vmem:[%s23_s1] sm:$0xf] %v4_v0 }

// kernel: tile.19
= control target key start
LH: loop header
LB: loop body
LE: loop exit
PB: predicated region body
PF: predicated region fallthrough
CT: control target
= control target key end

     0   :  { %vm7_vm0 = vcmask 64512   ;;  %s37_s8 = smov 8   ;;  %s38_s9 = smov 16   ;;  %vm13_vm1 = vcmask 261312   ;;  %vm19_vm2 = vcmask 195712   ;;  %vm25_vm3 = vcmask 130112   ;;  %s55_s0 = inlined_call_operand.vmem [shape: f32[4,8], index: 0, kind: input, shape index: {}]   ;;  %s56_s1 = inlined_call_operand.vmem [shape: f32[1,32], index: 1, kind: output, shape index: {}]  }
   0x1   :  { %v4_v0 = vld [vmem:[%s55_s0] sm:$0xf]  ;;  %s36_s0 = smov 24  }
   0x2   :  { %5 = vst [vmem:[#allocation1] sm:$0xf] %v4_v0 }
   0x9   :  { %v10_v1 = vld [vmem:[#allocation1 + $0x3] sm:$0x1]   ;;  %v22_v2 = vld [vmem:[#allocation1 + $0x1] sm:$0x1]   ;;  %v6_v3 = vld [vmem:[#allocation1] sm:$0x1]  }
   0xa   :  { %11 = vrot.lane.b32.xlu0 %v10_v1, %s36_s0  ;;  %23 = vrot.lane.b32.xlu1 %v22_v2, %s37_s8  ;;  %v16_v4 = vld [vmem:[#allocation1 + $0x2] sm:$0x1]   ;;  %8 = vst.msk [vmem:[#allocation0] sm:$0x1] %vm7_vm0, %v6_v3  }
   0xe   :  { %17 = vrot.lane.b32.xlu0 %v16_v4, %s38_s9 }
  0x7c   :  { %v12_v5 = vpop.permute.xlu0 %11   ;;  %v24_v6 = vpop.permute.xlu1 %23  }
  0x7d   :  { %14 = vst.msk [vmem:[#allocation0] sm:$0x1] %vm13_vm1, %v12_v5  }
  0x80   :  { %v18_v7 = vpop.permute.xlu0 %17  }
  0x81   :  { %20 = vst.msk [vmem:[#allocation0] sm:$0x1] %vm19_vm2, %v18_v7  }
  0x82   :  { %26 = vst.msk [vmem:[#allocation0] sm:$0x1] %vm25_vm3, %v24_v6  }
  0x89   :  { %v30_v8 = vld [vmem:[#allocation0] sm:$0x1] }
  0x8a   :  { %32 = vst [vmem:[%s56_s1] sm:$0x1] %v30_v8 }

// kernel: decoder_block_v1_forward.7
= control target key start
LH: loop header
LB: loop body
LE: loop exit
PB: predicated region body
PF: predicated region fallthrough
CT: control target
= control target key end

     0   :  { %s454_s12 = smov 0   ;;  %s645_s0 = inlined_call_operand.vmem [shape: f32[512,32], index: 0, kind: input, shape index: {}]   ;;  %s646_s1 = inlined_call_operand.vmem [shape: f32[1,32], index: 1, kind: input, shape index: {}]   ;;  %s647_s2 = inlined_call_operand.vmem [shape: f32[1,32], index: 2, kind: input, shape index: {}]   ;;  %s648_s3 = inlined_call_operand.vmem [shape: f32[512,32], index: 3, kind: output, shape index: {}]  }
   0x1 LB: > { %s405_s13 = sadd.s32 4294967295, %s432_s12   ;;  %p409_p0 = scmp.ge.s32.totalorder %s432_s12, 1  ;;  %s432_s12 = sphi %s454_s12, %s13_s12  }
   0x2   : > { %p138_p1 = scmp.lt.s32.totalorder %s432_s12, 3 }
   0x4   : > { %p139_p2 = pnand %p409_p0, %p138_p1 }
   0x5   : > { %s410_s14 = sshll.u32 (!%p139_p2), %s405_s13, 5  ;;  %v465_v0 = vld [vmem:[%s646_s1] ss:$0 sm:$0xff] (!%p139_p2)  ;;  %vm316_vm0 = vcmask (!%p139_p2), 261120  }
   0x6   : > { %142 = sbr.rel (%p139_p2) target bundleno = 46 (0x2e), region = 32  ;;  %p163_p3 = scmp.lt.s32.totalorder (!%p139_p2), %s410_s14, 63  ;;  %v475_v1 = vld [vmem:[%s647_s2] ss:$0 sm:$0xff] (!%p139_p2) }
   0xd   : > { %s650_s14 = smov (!%p163_p3, %s410_s14), 63 }
   0xe   : > { %s411_s15 = sshll.u32 %s650_s14, 3 }
   0xf   : > { %s470_s20 = scalar_lea.vmem %s645_s0, %s411_s15  ;;  %s498_s25 = scalar_lea.vmem %s648_s3, %s411_s15 }
  0x10   : > { %v174_v2 = vld [vmem:[%s470_s20] sm:$0xff]  ;;  %v175_v3 = vld [vmem:[%s470_s20 + $0x8] sm:$0xff]  ;;  %v176_v4 = vld [vmem:[%s470_s20 + $0x10] sm:$0xff] }
  0x11   : > { %v213_v5 = vmul.f32 %v465_v0, %v174_v2  ;;  %v214_v6 = vmul.f32 %v465_v0, %v175_v3  ;;  %v215_v7 = vmul.f32 %v465_v0, %v176_v4  ;;  %v177_v8 = vld [vmem:[%s470_s20 + $0x18] sm:$0xff]  ;;  %v178_v9 = vld [vmem:[%s470_s20 + $0x20] sm:$0xff]  ;;  %v179_v10 = vld [vmem:[%s470_s20 + $0x28] sm:$0xff] }
  0x12   : > { %v216_v11 = vmul.f32 %v465_v0, %v177_v8  ;;  %v217_v12 = vmul.f32 %v465_v0, %v178_v9  ;;  %v218_v13 = vmul.f32 %v465_v0, %v179_v10  ;;  %v180_v14 = vld [vmem:[%s470_s20 + $0x30] sm:$0xff]  ;;  %v181_v15 = vld [vmem:[%s470_s20 + $0x38] sm:$0xff]  ;;  %v182_v24 = vld [vmem:[%s470_s20 + $0x40] sm:$0xff] }
  0x13   : > { %v252_v16 = vadd.f32 %v475_v1, %v213_v5  ;;  %v253_v17 = vadd.f32 %v475_v1, %v214_v6  ;;  %v254_v18 = vadd.f32 %v475_v1, %v215_v7  ;;  %v219_v19 = vmul.f32 %v465_v0, %v180_v14  ;;  %v183_v25 = vld [vmem:[%s470_s20 + $0x48] sm:$0xff]  ;;  %v184_v26 = vld [vmem:[%s470_s20 + $0x50] sm:$0xff]  ;;  %v185_v31 = vld [vmem:[%s470_s20 + $0x58] sm:$0xff] }
  0x14   : > { %v255_v20 = vadd.f32 %v475_v1, %v216_v11  ;;  %v256_v21 = vadd.f32 %v475_v1, %v217_v12  ;;  %v257_v22 = vadd.f32 %v475_v1, %v218_v13  ;;  %v220_v23 = vmul.f32 %v465_v0, %v181_v15  ;;  %v186_v32 = vld [vmem:[%s470_s20 + $0x60] sm:$0xff]  ;;  %v187_v33 = vld [vmem:[%s470_s20 + $0x68] sm:$0xff]  ;;  %v188_v38 = vld [vmem:[%s470_s20 + $0x70] sm:$0xff] }
  0x15   : > { %v284_v27 = vmax.f32 %v252_v16, 0.0  ;;  %v285_v28 = vmax.f32 %v253_v17, 0.0  ;;  %v286_v29 = vmax.f32 %v254_v18, 0.0  ;;  %v258_v30 = vadd.f32 %v475_v1, %v219_v19  ;;  %v189_v43 = vld [vmem:[%s470_s20 + $0x78] sm:$0xff]  ;;  %v190_v56 = vld [vmem:[%s470_s20 + $0x80] sm:$0xff]  ;;  %v191_v57 = vld [vmem:[%s470_s20 + $0x88] sm:$0xff] }
  0x16   : > { %v287_v34 = vmax.f32 %v255_v20, 0.0  ;;  %v288_v35 = vmax.f32 %v256_v21, 0.0  ;;  %v289_v36 = vmax.f32 %v257_v22, 0.0  ;;  %v259_v37 = vadd.f32 %v475_v1, %v220_v23  ;;  %v192_v58 = vld [vmem:[%s470_s20 + $0x90] sm:$0xff]  ;;  %v193_v63 = vld [vmem:[%s470_s20 + $0x98] sm:$0xff]  ;;  %v194_v2 = vld [vmem:[%s470_s20 + $0xa0] sm:$0xff] }
  0x17   : > { %317 = vst.msk [vmem:[%s498_s25] sm:$0xff] %vm316_vm0, %v284_v27  ;;  %318 = vst.msk [vmem:[%s498_s25 + $0x8] sm:$0xff] %vm316_vm0, %v285_v28  ;;  %v290_v39 = vmax.f32 %v258_v30, 0.0  ;;  %v221_v40 = vmul.f32 %v465_v0, %v182_v24  ;;  %v222_v41 = vmul.f32 %v465_v0, %v183_v25  ;;  %v223_v42 = vmul.f32 %v465_v0, %v184_v26  ;;  %v195_v3 = vld [vmem:[%s470_s20 + $0xa8] sm:$0xff]  ;;  %v196_v8 = vld [vmem:[%s470_s20 + $0xb0] sm:$0xff] }
  0x18   : > { %319 = vst.msk [vmem:[%s498_s25 + $0x10] sm:$0xff] %vm316_vm0, %v286_v29  ;;  %320 = vst.msk [vmem:[%s498_s25 + $0x18] sm:$0xff] %vm316_vm0, %v287_v34  ;;  %v291_v44 = vmax.f32 %v259_v37, 0.0  ;;  %v224_v45 = vmul.f32 %v465_v0, %v185_v31  ;;  %v225_v46 = vmul.f32 %v465_v0, %v186_v32  ;;  %v226_v47 = vmul.f32 %v465_v0, %v187_v33  ;;  %v197_v13 = vld [vmem:[%s470_s20 + $0xb8] sm:$0xff]  ;;  %v198_v26 = vld [vmem:[%s470_s20 + $0xc0] sm:$0xff] }
  0x19   : > { %321 = vst.msk [vmem:[%s498_s25 + $0x20] sm:$0xff] %vm316_vm0, %v288_v35  ;;  %322 = vst.msk [vmem:[%s498_s25 + $0x28] sm:$0xff] %vm316_vm0, %v289_v36  ;;  %v260_v48 = vadd.f32 %v475_v1, %v221_v40  ;;  %v261_v49 = vadd.f32 %v475_v1, %v222_v41  ;;  %v262_v50 = vadd.f32 %v475_v1, %v223_v42  ;;  %v199_v27 = vld [vmem:[%s470_s20 + $0xc8] sm:$0xff]  ;;  %v200_v28 = vld [vmem:[%s470_s20 + $0xd0] sm:$0xff] }
  0x1a   : > { %323 = vst.msk [vmem:[%s498_s25 + $0x30] sm:$0xff] %vm316_vm0, %v290_v39  ;;  %v227_v51 = vmul.f32 %v465_v0, %v188_v38  ;;  %324 = vst.msk [vmem:[%s498_s25 + $0x38] sm:$0xff] %vm316_vm0, %v291_v44  ;;  %v263_v52 = vadd.f32 %v475_v1, %v224_v45  ;;  %v264_v53 = vadd.f32 %v475_v1, %v225_v46  ;;  %v201_v33 = vld [vmem:[%s470_s20 + $0xd8] sm:$0xff]  ;;  %v202_v34 = vld [vmem:[%s470_s20 + $0xe0] sm:$0xff] }
  0x1b   : > { %v265_v54 = vadd.f32 %v475_v1, %v226_v47  ;;  %v228_v55 = vmul.f32 %v465_v0, %v189_v43  ;;  %v292_v59 = vmax.f32 %v260_v48, 0.0  ;;  %v293_v60 = vmax.f32 %v261_v49, 0.0  ;;  %v203_v35 = vld [vmem:[%s470_s20 + $0xe8] sm:$0xff]  ;;  %v204_v40 = vld [vmem:[%s470_s20 + $0xf0] sm:$0xff]  ;;  %v205_v45 = vld [vmem:[%s470_s20 + $0xf8] sm:$0xff] }
  0x1c   : > { %v294_v61 = vmax.f32 %v262_v50, 0.0  ;;  %v266_v62 = vadd.f32 %v475_v1, %v227_v51  ;;  %v295_v4 = vmax.f32 %v263_v52, 0.0  ;;  %v296_v5 = vmax.f32 %v264_v53, 0.0 }
  0x1d   : > { %v297_v6 = vmax.f32 %v265_v54, 0.0  ;;  %v267_v7 = vadd.f32 %v475_v1, %v228_v55  ;;  %325 = vst.msk [vmem:[%s498_s25 + $0x40] sm:$0xff] %vm316_vm0, %v292_v59  ;;  %326 = vst.msk [vmem:[%s498_s25 + $0x48] sm:$0xff] %vm316_vm0, %v293_v60  ;;  %v229_v10 = vmul.f32 %v465_v0, %v190_v56  ;;  %v230_v11 = vmul.f32 %v465_v0, %v191_v57 }
  0x1e   : > { %327 = vst.msk [vmem:[%s498_s25 + $0x50] sm:$0xff] %vm316_vm0, %v294_v61  ;;  %v298_v9 = vmax.f32 %v266_v62, 0.0  ;;  %v231_v12 = vmul.f32 %v465_v0, %v192_v58  ;;  %328 = vst.msk [vmem:[%s498_s25 + $0x58] sm:$0xff] %vm316_vm0, %v295_v4  ;;  %v232_v15 = vmul.f32 %v465_v0, %v193_v63  ;;  %v233_v16 = vmul.f32 %v465_v0, %v194_v2 }
  0x1f   : > { %329 = vst.msk [vmem:[%s498_s25 + $0x60] sm:$0xff] %vm316_vm0, %v296_v5  ;;  %330 = vst.msk [vmem:[%s498_s25 + $0x68] sm:$0xff] %vm316_vm0, %v297_v6  ;;  %v299_v14 = vmax.f32 %v267_v7, 0.0  ;;  %v234_v17 = vmul.f32 %v465_v0, %v195_v3  ;;  %v268_v18 = vadd.f32 %v475_v1, %v229_v10  ;;  %v269_v19 = vadd.f32 %v475_v1, %v230_v11 }
  0x20   : > { %331 = vst.msk [vmem:[%s498_s25 + $0x70] sm:$0xff] %vm316_vm0, %v298_v9  ;;  %v270_v20 = vadd.f32 %v475_v1, %v231_v12  ;;  %v235_v21 = vmul.f32 %v465_v0, %v196_v8  ;;  %v271_v22 = vadd.f32 %v475_v1, %v232_v15  ;;  %v272_v23 = vadd.f32 %v475_v1, %v233_v16 }
  0x21   : > { %332 = vst.msk [vmem:[%s498_s25 + $0x78] sm:$0xff] %vm316_vm0, %v299_v14  ;;  %v273_v24 = vadd.f32 %v475_v1, %v234_v17  ;;  %v236_v25 = vmul.f32 %v465_v0, %v197_v13  ;;  %v300_v29 = vmax.f32 %v268_v18, 0.0  ;;  %v301_v30 = vmax.f32 %v269_v19, 0.0 }
  0x22   : > { %v302_v31 = vmax.f32 %v270_v20, 0.0  ;;  %v274_v32 = vadd.f32 %v475_v1, %v235_v21  ;;  %v303_v36 = vmax.f32 %v271_v22, 0.0  ;;  %v304_v37 = vmax.f32 %v272_v23, 0.0 }
  0x23   : > { %v305_v38 = vmax.f32 %v273_v24, 0.0  ;;  %v275_v39 = vadd.f32 %v475_v1, %v236_v25  ;;  %333 = vst.msk [vmem:[%s498_s25 + $0x80] sm:$0xff] %vm316_vm0, %v300_v29  ;;  %334 = vst.msk [vmem:[%s498_s25 + $0x88] sm:$0xff] %vm316_vm0, %v301_v30  ;;  %v237_v42 = vmul.f32 %v465_v0, %v198_v26  ;;  %v238_v43 = vmul.f32 %v465_v0, %v199_v27 }
  0x24   : > { %335 = vst.msk [vmem:[%s498_s25 + $0x90] sm:$0xff] %vm316_vm0, %v302_v31  ;;  %v306_v41 = vmax.f32 %v274_v32, 0.0  ;;  %v239_v44 = vmul.f32 %v465_v0, %v200_v28  ;;  %336 = vst.msk [vmem:[%s498_s25 + $0x98] sm:$0xff] %vm316_vm0, %v303_v36  ;;  %v240_v47 = vmul.f32 %v465_v0, %v201_v33  ;;  %v241_v48 = vmul.f32 %v465_v0, %v202_v34 }
  0x25   : > { %337 = vst.msk [vmem:[%s498_s25 + $0xa0] sm:$0xff] %vm316_vm0, %v304_v37  ;;  %338 = vst.msk [vmem:[%s498_s25 + $0xa8] sm:$0xff] %vm316_vm0, %v305_v38  ;;  %v307_v46 = vmax.f32 %v275_v39, 0.0  ;;  %v242_v49 = vmul.f32 %v465_v0, %v203_v35  ;;  %v276_v50 = vadd.f32 %v475_v1, %v237_v42  ;;  %v277_v51 = vadd.f32 %v475_v1, %v238_v43 }
  0x26   : > { %339 = vst.msk [vmem:[%s498_s25 + $0xb0] sm:$0xff] %vm316_vm0, %v306_v41  ;;  %v278_v52 = vadd.f32 %v475_v1, %v239_v44  ;;  %v243_v53 = vmul.f32 %v465_v0, %v204_v40  ;;  %v279_v54 = vadd.f32 %v475_v1, %v240_v47  ;;  %v280_v55 = vadd.f32 %v475_v1, %v241_v48 }
  0x27   : > { %340 = vst.msk [vmem:[%s498_s25 + $0xb8] sm:$0xff] %vm316_vm0, %v307_v46  ;;  %v281_v56 = vadd.f32 %v475_v1, %v242_v49  ;;  %v244_v57 = vmul.f32 %v465_v0, %v205_v45  ;;  %v308_v58 = vmax.f32 %v276_v50, 0.0  ;;  %v309_v59 = vmax.f32 %v277_v51, 0.0 }
  0x28   : > { %v310_v60 = vmax.f32 %v278_v52, 0.0  ;;  %v282_v61 = vadd.f32 %v475_v1, %v243_v53  ;;  %v311_v62 = vmax.f32 %v279_v54, 0.0  ;;  %v312_v63 = vmax.f32 %v280_v55, 0.0 }
  0x29   : > { %v313_v2 = vmax.f32 %v281_v56, 0.0  ;;  %v283_v3 = vadd.f32 %v475_v1, %v244_v57  ;;  %341 = vst.msk [vmem:[%s498_s25 + $0xc0] sm:$0xff] %vm316_vm0, %v308_v58  ;;  %342 = vst.msk [vmem:[%s498_s25 + $0xc8] sm:$0xff] %vm316_vm0, %v309_v59 }
  0x2a   : > { %343 = vst.msk [vmem:[%s498_s25 + $0xd0] sm:$0xff] %vm316_vm0, %v310_v60  ;;  %v314_v4 = vmax.f32 %v282_v61, 0.0  ;;  %344 = vst.msk [vmem:[%s498_s25 + $0xd8] sm:$0xff] %vm316_vm0, %v311_v62 }
  0x2b   : > { %345 = vst.msk [vmem:[%s498_s25 + $0xe0] sm:$0xff] %vm316_vm0, %v312_v63  ;;  %346 = vst.msk [vmem:[%s498_s25 + $0xe8] sm:$0xff] %vm316_vm0, %v313_v2  ;;  %v315_v0 = vmax.f32 %v283_v3, 0.0 }
  0x2c   : > { %347 = vst.msk [vmem:[%s498_s25 + $0xf0] sm:$0xff] %vm316_vm0, %v314_v4 }
  0x2d   : > { %348 = vst.msk [vmem:[%s498_s25 + $0xf8] sm:$0xff] %vm316_vm0, %v315_v0 }
  0x2e PF: > { %s13_s12 = sadd.s32 1, %s432_s12  }
  0x2f   : > { %p10_p4 = scmp.ge.s32.totalorder %s13_s12, 4  }
  0x31   :  { %12 = sbr.rel (!%p10_p4) target bundleno = 1 (0x1), region = 62 }

</bundles_post_ra>
